<compile_context>
chip_gen: v6e
topology: v6e:2x2x1
jax: 0.10.0
libtpu: 0.0.40
codegen_flags: <defaults>
</compile_context>

<pallas_src>
import math

import jax
import jax.numpy as jnp
from jax import lax
from jax.experimental import pallas as pl
from jax.experimental.pallas import tpu as pltpu

# LMMD kernel hyper-parameters (kernel_mul / kernel_num from MMDLoss __init__,
# fix_sigma is always None in the reference module).
KERNEL_MUL = 2.0
KERNEL_NUM = 5

# dot_general dimension numbers: contract the last dims of both operands
# (i.e. x @ y.T without tracing a transpose -> no XLU vxpose / VMEM temp).
_CONTRACT_LAST = (((1,), (1,)), ((), ()))


# ----------------------------------------------------------------------------
# Pallas kernel: weighted multi-scale RBF-MMD (the LMMD hot path).
# ----------------------------------------------------------------------------
def _lmmd_rbf_kernel(xs_ref, xt_ref, sv_ref, tv_ref, svm_ref, tvm_ref, out_ref):
    # Keep all l2 / bandwidth math in f32 (the Gram-identity cancellation is
    # dtype sensitive); inputs may arrive bf16 and are cast here, in VMEM.
    xs = xs_ref[...].astype(jnp.float32)                 # (B, D) source rows
    xt = xt_ref[...].astype(jnp.float32)                 # (B, D) target rows
    b = xs.shape[0]
    n = 2 * b                                            # rows of `total`

    total = jnp.concatenate([xs, xt], axis=0)            # (2B, D) sublane concat

    # Row squared norms + closed-form sum of the full (2B,2B) pairwise-L2 matrix:
    #   sum_{i,j} ||x_i - x_j||^2 = 2*N*sum_i ||x_i||^2 - 2*||sum_i x_i||^2
    nrm = jnp.sum(total * total, axis=-1, keepdims=True)  # (2B, 1)
    col = jnp.sum(total, axis=0, keepdims=True)           # (1, D)
    sum_l2 = 2.0 * float(n) * jnp.sum(nrm) - 2.0 * jnp.sum(col * col)

    # bandwidth = sum(L2) / (N^2 - N), then /= kernel_mul**(kernel_num//2)
    bandwidth = sum_l2 / float(n * n - n)
    bandwidth = bandwidth / (KERNEL_MUL ** (KERNEL_NUM // 2))
    # NOTE: all-identical rows => sum_l2 == 0 => bandwidth == 0 => z == NaN
    # below => guard returns 0, same as the reference's isnan early-out.
    neg_inv_bw = -1.0 / bandwidth                         # single scalar divide

    # One fused Gram on the MXU; l2 quadrants are [SS ST; TS TT].
    g = lax.dot_general(total, total, _CONTRACT_LAST,
                        preferred_element_type=jnp.float32)      # (2B, 2B)
    l2 = jnp.maximum(nrm + nrm.T - 2.0 * g, 0.0)

    # LMMD weights built in-kernel from the (B, C) class vectors:
    #   W = [svm; -tvm] @ [s_vec; -t_vec]^T = [[wss, -wst], [-wst^T, wtt]]
    # so sum(W * K) == sum(wss*SS + wtt*TT - 2*wst*ST) exactly (K symmetric);
    # the -2 factor is folded into the operands -> no extra (2B,2B) multiply,
    # and no B^2 weight matrices are read from HBM.
    sv = sv_ref[...].astype(jnp.float32)                  # (B, C)
    tv = tv_ref[...].astype(jnp.float32)                  # (B, C)
    svm = svm_ref[...].astype(jnp.float32)                # (B, C) masked/scaled
    tvm = tvm_ref[...].astype(jnp.float32)                # (B, C) masked/scaled
    u = jnp.concatenate([svm, -tvm], axis=0)              # (2B, C)
    v = jnp.concatenate([sv, -tv], axis=0)                # (2B, C)
    w = lax.dot_general(u, v, _CONTRACT_LAST,
                        preferred_element_type=jnp.float32)      # (2B, 2B)

    # Hoisted bandwidth scale: z computed once; per-scale factors are Python
    # constants, so the only per-element work in the loop is the EUP exp.
    z = l2 * neg_inv_bw
    k_sum = jnp.exp(z)                                    # scale 1/2^0
    for i in range(1, KERNEL_NUM):                        # static unroll: 5 scales
        k_sum = k_sum + jnp.exp(z * (1.0 / KERNEL_MUL ** i))

    # One weighted combine + one cross-lane reduction.
    acc = jnp.sum(w * k_sum)
    # NaN guard over the summed kernel matrix only (matches the reference,
    # which never scans the weights).
    bad = jnp.isnan(jnp.sum(k_sum))
    out_ref[0, 0] = jnp.where(bad, jnp.float32(0.0), acc)


def lmmd_rbf_pallas(source, target, s_vec, t_vec, svm, tvm):
    b, d = source.shape
    c = s_vec.shape[-1]
    n = 2 * b
    # TODO(synk): for very large B (resident footprint ~(2*B*D + ~6*(2B)^2)*4 B vs
    # 32 MiB scoped / 64 MiB physical VMEM on v7x, 16 MiB scoped on v5e) switch to
    # a 2-D ("parallel","parallel") grid over (B,B) kernel blocks with a bandwidth
    # prologue pass, skip the TS quadrant, and raise vmem_limit_bytes via
    # pltpu.CompilerParams.
    cost = pl.CostEstimate(
        flops=2 * n * n * d + 2 * n * n * c,              # fused Gram + weight matmul
        transcendentals=KERNEL_NUM * n * n,               # 5-scale exp stream
        bytes_accessed=source.dtype.itemsize * 2 * b * d
        + 4 * 4 * b * c + 4,
    )
    return pl.pallas_call(
        _lmmd_rbf_kernel,
        out_shape=jax.ShapeDtypeStruct((1, 1), jnp.float32),
        in_specs=[pl.BlockSpec(memory_space=pltpu.MemorySpace.VMEM)] * 6,
        out_specs=pl.BlockSpec(memory_space=pltpu.MemorySpace.SMEM),
        cost_estimate=cost,
    )(source, target, s_vec, t_vec, svm, tvm)


# ----------------------------------------------------------------------------
# Glue: LMMD class-conditional weight *factors* (weights themselves are built
# in-kernel).  Faithful JAX port of cal_weight's vectors.
# TODO(synk): the original snippet reshapes t_tvec to (1, -1) which makes
# np.dot fail for batch>1; we follow the canonical DeepDA LMMD weights
# (weight_ss / weight_tt / weight_st all (B, B)).
# ----------------------------------------------------------------------------
def cal_weight_vectors(source_label, target_logits, num_class):
    classes = jnp.arange(num_class)

    onehot = (source_label[:, None] == classes[None, :]).astype(jnp.float32)
    s_sum = jnp.sum(onehot, axis=0, keepdims=True)
    s_sum = jnp.where(s_sum == 0, 100.0, s_sum)
    s_vec = onehot / s_sum                                # (B, C)

    target_label = jnp.argmax(target_logits, axis=1)
    t_sum = jnp.sum(target_logits, axis=0, keepdims=True)
    t_sum = jnp.where(t_sum == 0, 100.0, t_sum)
    t_vec = (target_logits / t_sum).astype(jnp.float32)   # (B, C)

    in_s = jnp.any(source_label[:, None] == classes[None, :], axis=0)
    in_t = jnp.any(target_label[:, None] == classes[None, :], axis=0)
    mask = jnp.logical_and(in_s, in_t).astype(jnp.float32)  # (C,)
    count = jnp.sum(mask)
    denom = jnp.where(count == 0, 1.0, count)
    scale = mask / denom                                  # all-zero when count == 0
    return s_vec, t_vec, s_vec * scale[None, :], t_vec * scale[None, :]


# Full (B,B) weight matrices — used ONLY by the pure-JAX reference below so the
# verification path stays independent of the in-kernel factorization.
def cal_weight_matrices(source_label, target_logits, num_class):
    s_vec, t_vec, svm, tvm = cal_weight_vectors(source_label, target_logits, num_class)
    weight_ss = svm @ s_vec.T
    weight_tt = tvm @ t_vec.T
    weight_st = svm @ t_vec.T
    return weight_ss, weight_tt, weight_st


# ----------------------------------------------------------------------------
# Module-equivalent Python classes (state kept on host, math on TPU).
# ----------------------------------------------------------------------------
class LambdaScheduler:
    def __init__(self, gamma=1.0, max_iter=1000, **kwargs):
        self.gamma = gamma
        self.max_iter = max_iter
        self.curr_iter = 0

    def lamb(self):
        p = self.curr_iter / self.max_iter
        return 2.0 / (1.0 + math.exp(-self.gamma * p)) - 1.0

    def step(self):
        self.curr_iter = min(self.curr_iter + 1, self.max_iter)


class LMMDLoss(LambdaScheduler):
    def __init__(self, num_class, kernel_type='rbf', kernel_mul=2.0,
                 kernel_num=5, fix_sigma=None, gamma=1.0, max_iter=1000, **kw):
        super().__init__(gamma=gamma, max_iter=max_iter)
        if kernel_type != 'rbf':
            raise NotImplementedError('Linear kernel is not supported yet.')
        self.num_class = num_class
        # kernel_mul / kernel_num are baked into the Pallas kernel as constants.

    def forward(self, source, target, source_label, target_logits):
        s_vec, t_vec, svm, tvm = cal_weight_vectors(
            source_label, target_logits, self.num_class)
        loss = lmmd_rbf_pallas(source, target, s_vec, t_vec, svm, tvm)[0, 0]
        lamb = self.lamb()
        # TODO(synk): original skips lamb*/step() when kernels contain NaN (it
        # early-returns 0); here the kernel returns 0 on NaN and we always step.
        self.step()
        return loss * lamb


class TransferLoss:
    def __init__(self, loss_type, **kwargs):
        if loss_type == 'lmmd':
            self.loss_func = LMMDLoss(**kwargs)
        else:
            raise NotImplementedError('{} is not supported.'.format(loss_type))

    def __call__(self, source, target, **kwargs):
        return self.loss_func.forward(source, target, **kwargs)


# ----------------------------------------------------------------------------
# Pure-JAX reference (faithful broadcast-subtract form) for verification.
# ----------------------------------------------------------------------------
def reference_lmmd(source, target, source_label, target_logits, num_class,
                   curr_iter, gamma=1.0, max_iter=1000):
    wss, wtt, wst = cal_weight_matrices(source_label, target_logits, num_class)
    total = jnp.concatenate([source, target], axis=0).astype(jnp.float32)
    n = total.shape[0]
    diff = total[:, None, :] - total[None, :, :]
    l2 = jnp.sum(diff * diff, axis=-1)
    bw = jnp.sum(l2) / (n * n - n) / (KERNEL_MUL ** (KERNEL_NUM // 2))
    kern = sum(jnp.exp(-l2 / (bw * KERNEL_MUL ** i)) for i in range(KERNEL_NUM))
    b = source.shape[0]
    ss, tt, st = kern[:b, :b], kern[b:, b:], kern[:b, b:]
    loss = jnp.sum(wss * ss + wtt * tt - 2.0 * wst * st)
    lamb = 2.0 / (1.0 + math.exp(-gamma * curr_iter / max_iter)) - 1.0
    return loss * lamb


if __name__ == "__main__":
    B, D, C = 8, 32, 4
    key = jax.random.PRNGKey(0)
    k1, k2, k3, k4 = jax.random.split(key, 4)
    source = jax.random.normal(k1, (B, D), dtype=jnp.float32)
    target = jax.random.normal(k2, (B, D), dtype=jnp.float32) + 0.5
    source_label = jax.random.randint(k3, (B,), 0, C)
    target_logits = jax.nn.softmax(
        jax.random.normal(k4, (B, C), dtype=jnp.float32), axis=-1)

    loss_mod = TransferLoss('lmmd', num_class=C, kernel_type='rbf',
                            kernel_mul=2.0, kernel_num=5,
                            gamma=1.0, max_iter=1000)
    loss_mod.loss_func.curr_iter = 250  # mid-training state so lamb != 0

    loss = loss_mod(source, target,
                    source_label=source_label, target_logits=target_logits)
    loss = jax.block_until_ready(loss)

    ref = reference_lmmd(source, target, source_label, target_logits, C,
                         curr_iter=250)
    ref = jax.block_until_ready(ref)
    # Tolerance covers the Gram-identity vs. broadcast-subtract rounding delta.
    assert jnp.allclose(loss, ref, rtol=2e-4, atol=1e-5), (loss, ref)
    print("KERNEL_OK")
</pallas_src>

<mosaic_0001>
module attributes {stable_mosaic.version = 11 : i64} {
  func.func @_lmmd_rbf_kernel(%arg0: memref<8x32xf32, #tpu.memory_space<vmem>>, %arg1: memref<8x32xf32, #tpu.memory_space<vmem>>, %arg2: memref<8x4xf32, #tpu.memory_space<vmem>>, %arg3: memref<8x4xf32, #tpu.memory_space<vmem>>, %arg4: memref<8x4xf32, #tpu.memory_space<vmem>>, %arg5: memref<8x4xf32, #tpu.memory_space<vmem>>, %arg6: memref<1x1xf32, #tpu.memory_space<smem>>) attributes {dimension_semantics = [], scalar_prefetch = 0 : i64, scratch_operands = 0 : i64, tpu.core_type = #tpu.core_type<tc>} {
    %c0 = arith.constant 0 : index
    %c0_0 = arith.constant 0 : index
    %0 = vector.load %arg0[%c0, %c0_0] : memref<8x32xf32, #tpu.memory_space<vmem>>, vector<8x32xf32>
    %c0_1 = arith.constant 0 : index
    %c0_2 = arith.constant 0 : index
    %1 = vector.load %arg1[%c0_1, %c0_2] : memref<8x32xf32, #tpu.memory_space<vmem>>, vector<8x32xf32>
    %2 = tpu.concatenate %0, %1 in 0 : vector<8x32xf32>, vector<8x32xf32> -> vector<16x32xf32>
    %3 = arith.mulf %2, %2 : vector<16x32xf32>
    %cst = arith.constant dense<0.000000e+00> : vector<16xf32>
    %4 = vector.multi_reduction <add>, %3, %cst [1] : vector<16x32xf32> to vector<16xf32>
    %5 = vector.shape_cast %4 : vector<16xf32> to vector<16x1xf32>
    %cst_3 = arith.constant dense<0.000000e+00> : vector<32xf32>
    %6 = vector.multi_reduction <add>, %2, %cst_3 [0] : vector<16x32xf32> to vector<32xf32>
    %7 = vector.shape_cast %6 : vector<32xf32> to vector<1x32xf32>
    %8 = vector.shape_cast %5 : vector<16x1xf32> to vector<1x16x1xf32>
    %cst_4 = arith.constant dense<0.000000e+00> : vector<1xf32>
    %9 = vector.multi_reduction <add>, %8, %cst_4 [1, 2] : vector<1x16x1xf32> to vector<1xf32>
    %10 = vector.shape_cast %9 : vector<1xf32> to vector<1x1x1xf32>
    %11 = vector.extract %10[0, 0, 0] : f32 from vector<1x1x1xf32>
    %cst_5 = arith.constant 3.200000e+01 : f32
    %12 = arith.mulf %cst_5, %11 : f32
    %13 = arith.mulf %7, %7 : vector<1x32xf32>
    %14 = vector.shape_cast %13 : vector<1x32xf32> to vector<1x1x32xf32>
    %cst_6 = arith.constant dense<0.000000e+00> : vector<1xf32>
    %15 = vector.multi_reduction <add>, %14, %cst_6 [1, 2] : vector<1x1x32xf32> to vector<1xf32>
    %16 = vector.shape_cast %15 : vector<1xf32> to vector<1x1x1xf32>
    %17 = vector.extract %16[0, 0, 0] : f32 from vector<1x1x1xf32>
    %cst_7 = arith.constant 2.000000e+00 : f32
    %18 = arith.mulf %cst_7, %17 : f32
    %19 = arith.subf %12, %18 : f32
    %cst_8 = arith.constant 2.400000e+02 : f32
    %20 = arith.divf %19, %cst_8 : f32
    %cst_9 = arith.constant 4.000000e+00 : f32
    %21 = arith.divf %20, %cst_9 : f32
    %cst_10 = arith.constant -1.000000e+00 : f32
    %22 = arith.divf %cst_10, %21 : f32
    %cst_11 = arith.constant dense<0.000000e+00> : vector<16x16xf32>
    %23 = tpu.matmul %2, %2, %cst_11 {dimension_numbers = #tpu.dot_dimension_numbers<[1], [1], [0], [0], [0, 0, 1, 0], [], []>} : vector<16x32xf32>, vector<16x32xf32>, vector<16x16xf32> -> vector<16x16xf32>
    %24 = tpu.transpose %5, [1, 0] : vector<16x1xf32> -> vector<1x16xf32>
    %25 = vector.broadcast %5 : vector<16x1xf32> to vector<16x16xf32>
    %26 = vector.broadcast %24 : vector<1x16xf32> to vector<16x16xf32>
    %27 = arith.addf %25, %26 : vector<16x16xf32>
    %cst_12 = arith.constant 2.000000e+00 : f32
    %28 = vector.broadcast %cst_12 : f32 to vector<16x16xf32>
    %29 = arith.mulf %28, %23 : vector<16x16xf32>
    %30 = arith.subf %27, %29 : vector<16x16xf32>
    %cst_13 = arith.constant 0.000000e+00 : f32
    %31 = vector.broadcast %cst_13 : f32 to vector<16x16xf32>
    %32 = arith.maximumf %30, %31 : vector<16x16xf32>
    %c0_14 = arith.constant 0 : index
    %c0_15 = arith.constant 0 : index
    %33 = vector.load %arg2[%c0_14, %c0_15] : memref<8x4xf32, #tpu.memory_space<vmem>>, vector<8x4xf32>
    %c0_16 = arith.constant 0 : index
    %c0_17 = arith.constant 0 : index
    %34 = vector.load %arg3[%c0_16, %c0_17] : memref<8x4xf32, #tpu.memory_space<vmem>>, vector<8x4xf32>
    %c0_18 = arith.constant 0 : index
    %c0_19 = arith.constant 0 : index
    %35 = vector.load %arg4[%c0_18, %c0_19] : memref<8x4xf32, #tpu.memory_space<vmem>>, vector<8x4xf32>
    %c0_20 = arith.constant 0 : index
    %c0_21 = arith.constant 0 : index
    %36 = vector.load %arg5[%c0_20, %c0_21] : memref<8x4xf32, #tpu.memory_space<vmem>>, vector<8x4xf32>
    %cst_22 = arith.constant 0.000000e+00 : f32
    %37 = vector.broadcast %cst_22 : f32 to vector<8x4xf32>
    %38 = arith.subf %37, %36 : vector<8x4xf32>
    %39 = tpu.concatenate %35, %38 in 0 : vector<8x4xf32>, vector<8x4xf32> -> vector<16x4xf32>
    %cst_23 = arith.constant 0.000000e+00 : f32
    %40 = vector.broadcast %cst_23 : f32 to vector<8x4xf32>
    %41 = arith.subf %40, %34 : vector<8x4xf32>
    %42 = tpu.concatenate %33, %41 in 0 : vector<8x4xf32>, vector<8x4xf32> -> vector<16x4xf32>
    %cst_24 = arith.constant dense<0.000000e+00> : vector<16x16xf32>
    %43 = tpu.matmul %39, %42, %cst_24 {dimension_numbers = #tpu.dot_dimension_numbers<[1], [1], [0], [0], [0, 0, 1, 0], [], []>} : vector<16x4xf32>, vector<16x4xf32>, vector<16x16xf32> -> vector<16x16xf32>
    %44 = vector.broadcast %22 : f32 to vector<16x16xf32>
    %45 = arith.mulf %32, %44 : vector<16x16xf32>
    %46 = math.exp %45 : vector<16x16xf32>
    %cst_25 = arith.constant 5.000000e-01 : f32
    %47 = vector.broadcast %cst_25 : f32 to vector<16x16xf32>
    %48 = arith.mulf %45, %47 : vector<16x16xf32>
    %49 = math.exp %48 : vector<16x16xf32>
    %50 = arith.addf %46, %49 : vector<16x16xf32>
    %cst_26 = arith.constant 2.500000e-01 : f32
    %51 = vector.broadcast %cst_26 : f32 to vector<16x16xf32>
    %52 = arith.mulf %45, %51 : vector<16x16xf32>
    %53 = math.exp %52 : vector<16x16xf32>
    %54 = arith.addf %50, %53 : vector<16x16xf32>
    %cst_27 = arith.constant 1.250000e-01 : f32
    %55 = vector.broadcast %cst_27 : f32 to vector<16x16xf32>
    %56 = arith.mulf %45, %55 : vector<16x16xf32>
    %57 = math.exp %56 : vector<16x16xf32>
    %58 = arith.addf %54, %57 : vector<16x16xf32>
    %cst_28 = arith.constant 6.250000e-02 : f32
    %59 = vector.broadcast %cst_28 : f32 to vector<16x16xf32>
    %60 = arith.mulf %45, %59 : vector<16x16xf32>
    %61 = math.exp %60 : vector<16x16xf32>
    %62 = arith.addf %58, %61 : vector<16x16xf32>
    %63 = arith.mulf %43, %62 : vector<16x16xf32>
    %64 = vector.shape_cast %63 : vector<16x16xf32> to vector<1x16x16xf32>
    %cst_29 = arith.constant dense<0.000000e+00> : vector<1xf32>
    %65 = vector.multi_reduction <add>, %64, %cst_29 [1, 2] : vector<1x16x16xf32> to vector<1xf32>
    %66 = vector.shape_cast %65 : vector<1xf32> to vector<1x1x1xf32>
    %67 = vector.extract %66[0, 0, 0] : f32 from vector<1x1x1xf32>
    %68 = vector.shape_cast %62 : vector<16x16xf32> to vector<1x16x16xf32>
    %cst_30 = arith.constant dense<0.000000e+00> : vector<1xf32>
    %69 = vector.multi_reduction <add>, %68, %cst_30 [1, 2] : vector<1x16x16xf32> to vector<1xf32>
    %70 = vector.shape_cast %69 : vector<1xf32> to vector<1x1x1xf32>
    %71 = vector.extract %70[0, 0, 0] : f32 from vector<1x1x1xf32>
    %72 = arith.cmpf one, %71, %71 : f32
    %cst_31 = arith.constant 0.000000e+00 : f32
    %73 = arith.select %72, %cst_31, %67 : f32
    %c0_32 = arith.constant 0 : index
    %c0_33 = arith.constant 0 : index
    %74 = memref.load %arg6[%c0_32, %c0_33] : memref<1x1xf32, #tpu.memory_space<smem>>
    memref.store %73, %arg6[%c0_32, %c0_33] : memref<1x1xf32, #tpu.memory_space<smem>>
    return
  }
}

</mosaic_0001>

<bundles_post_ra>
// kernel: tpu_custom_call.1
= control target key start
LH: loop header
LB: loop body
LE: loop exit
PB: predicated region body
PF: predicated region fallthrough
CT: control target
= control target key end

     0   :  { %vm28_vm0 = vcmask 261120   ;;  %s525_s0 = inlined_call_operand.vmem [shape: f32[8,32], index: 0, kind: input, shape index: {}]   ;;  %s526_s1 = inlined_call_operand.vmem [shape: f32[8,32], index: 1, kind: input, shape index: {}]   ;;  %s527_s2 = inlined_call_operand.vmem [shape: f32[8,4], index: 2, kind: input, shape index: {}]   ;;  %s528_s3 = inlined_call_operand.vmem [shape: f32[8,4], index: 3, kind: input, shape index: {}]   ;;  %s529_s4 = inlined_call_operand.vmem [shape: f32[8,4], index: 4, kind: input, shape index: {}]   ;;  %s530_s5 = inlined_call_operand.vmem [shape: f32[8,4], index: 5, kind: input, shape index: {}]   ;;  %s531_s6 = inlined_call_operand.hbm [shape: f32[1,1], index: 6, kind: output, shape index: {}]  }
   0x1   :  { %v24_v0 = vld [vmem:[%s525_s0] sm:$0xff] }
   0x2   :  { %v25_v1 = vld [vmem:[%s526_s1] sm:$0xff] }
   0x3   :  { %11 = vsyncpa [#allocation3], 0  ;;  %v26_v2 = vmul.f32 %v24_v0, %v24_v0  ;;  %v27_v3 = vmul.f32 %v25_v1, %v25_v1  ;;  %400 = vmatprep.subr.msk.mxu0 %vm28_vm0, %v25_v1  ;;  %404 = vmatprep.mubr.msk.f32.mxu0 %vm28_vm0, %v24_v0  ;;  %v35_v6 = vsel %vm28_vm0, %v24_v0, 0.0  ;;  %v36_v7 = vsel %vm28_vm0, %v25_v1, 0.0  ;;  %v208_v9 = vld [vmem:[%s528_s3] sm:$0xff]  ;;  %s458_s14 = smov [#allocation2]  }
   0x4   :  { %401 = vmatpush3.xpose.msk.msra.mxu0 %vm28_vm0, %v25_v1  ;;  %v37_v8 = vadd.f32 %v36_v7, %v35_v6  ;;  %vm213_vm1 = vcmask 31744   ;;  %v209_v10 = vld [vmem:[%s529_s4] sm:$0xff]  ;;  %v212_v11 = vsub.f32 0.0, %v208_v9  ;;  %vm44_vm2 = vcmask 7168  }
   0x5   :  { %v29_v4 = vsel %vm28_vm0, %v26_v2, 0.0  ;;  %402 = vmatprep.subr.msk.mxu0 %vm28_vm0, %v24_v0  ;;  %v32_v5 = vsel %vm28_vm0, %v27_v3, 0.0  ;;  %411 = vmatprep.mubr.msk.f32.mxu1 %vm213_vm1, %v209_v10  ;;  %v207_v12 = vld [vmem:[%s527_s2] sm:$0xff]  ;;  %vm59_vm3 = vcmask 253952   ;;  %v195_v44 = vlaneseq }
   0x6   :  { %30 = vadd.xlane.f32.xlu0 %v29_v4  ;;  %407 = vmatprep.subr.msk.mxu1 %vm213_vm1, %v212_v11  ;;  %v210_v13 = vld [vmem:[%s530_s5] sm:$0xff]  ;;  %v38_v15 = vrot.slane %v37_v8, 4  ;;  %vm342_vm4 = vcmask 130048  }
   0x7   :  { %408 = vmatpush3.xpose.msk.msra.mxu1 %vm213_vm1, %v212_v11  ;;  %v211_v14 = vsub.f32 0.0, %v210_v13  ;;  %v196_v45 = vshrl.u32 %v195_v44, 7 }
   0x8   :  { %403 = vmatpush3.xpose.msk.msra.mxu0 %vm28_vm0, %v24_v0  ;;  %409 = vmatprep.subr.msk.mxu1 %vm213_vm1, %v207_v12  ;;  %v39_v16 = vadd.f32 %v38_v15, %v37_v8 }
   0x9   :  { %v197_v46 = vsub.s32 0, %v196_v45 }
   0xa   :  { %33 = vadd.xlane.f32.xlu0 %v32_v5  ;;  %v40_v17 = vrot.slane %v39_v16, 2 }
   0xb   :  { %405 = vmatmul.mubr.msk.f32.vlgmr.msra.gmra.mxu0 %vm28_vm0, %v25_v1  ;;  %410 = vmatpush3.xpose.msk.msra.mxu1 %vm213_vm1, %v207_v12 }
   0xc   :  { %v41_v18 = vadd.f32 %v40_v17, %v39_v16 }
   0xe   :  { %412 = vmatmul.mubr.msk.f32.vlgmr.msra.gmra.mxu1 %vm213_vm1, %v211_v14  ;;  %v42_v19 = vrot.slane %v41_v18, 1 }
  0x10   :  { %v43_v21 = vadd.f32 %v42_v19, %v41_v18 }
  0x12   :  { %v58_v25 = vmul.f32 %v43_v21, %v43_v21 }
  0x14   :  { %v60_v27 = vsel %vm59_vm3, %v58_v25, 0.0 }
  0x8f   :  { %v31_v20 = vpop.xlane.xlu0 %30 }
  0x90   :  { %163 = vxpose.xlu0.b32.start [1/2] (short) (narrow) %v31_v20, 8  ;;  %v45_v23 = vsel %vm44_vm2, %v31_v20, 0.0 }
  0x93   :  { %v34_v22 = vpop.xlane.xlu0 %33 }
  0x94   :  { %164 = vxpose.xlu0.b32.end [2/2] (short) (narrow) %v34_v22, 8  ;;  %v46_v24 = vsel %vm44_vm2, %v34_v22, 0.0 }
  0x95   :  { %v47_v26 = vadd.f32 %v46_v24, %v45_v23 }
  0x97   :  { %48 = vadd.xlane.f32.xlu1 %v47_v26 }
  0x9b   :  { %61 = vadd.xlane.f32.xlu1 %v60_v27 }
  0xcb   :  { %v406_v47 = vpop.f32.mrf.mxu0 }
  0xcc   :  { %v202_v51 = vmul.f32 2.0, %v406_v47 }
  0xcd   :  { %v154_v50 = vpop.f32.mrf.mxu0 }
  0xce   :  { %v201_v54 = vmul.f32 2.0, %v154_v50  ;;  %v413_v26 = vpop.f32.mrf.mxu1 }
 0x10c   :  { %v179_v48 = vpop.trf.xlu0 }
 0x10d   :  { %v198_v49 = vrot.slane %v179_v48, %v197_v46 }
 0x10f   :  { %v199_v52 = vadd.f32 %v198_v49, %v31_v20  ;;  %v200_v53 = vadd.f32 %v198_v49, %v34_v22 }
 0x111   :  { %v203_v55 = vsub.f32 %v199_v52, %v201_v54  ;;  %v204_v56 = vsub.f32 %v200_v53, %v202_v51 }
 0x113   :  { %v205_v57 = vmax.f32 %v203_v55, 0.0  ;;  %v206_v58 = vmax.f32 %v204_v56, 0.0 }
 0x120   :  { %v49_v28 = vpop.xlane.xlu1 %48 }
 0x121   :  { %v50_v29 = vrot.slane %v49_v28, 4 }
 0x123   :  { %v51_v30 = vadd.f32 %v50_v29, %v49_v28 }
 0x124   :  { %v62_v31 = vpop.xlane.xlu1 %61 }
 0x125   :  { %v52_v32 = vrot.slane %v51_v30, 2  ;;  %v63_v33 = vrot.slane %v62_v31, 4 }
 0x127   :  { %v64_v34 = vadd.f32 %v63_v33, %v62_v31  ;;  %v53_v35 = vadd.f32 %v52_v32, %v51_v30 }
 0x129   :  { %v65_v36 = vrot.slane %v64_v34, 2  ;;  %v54_v37 = vrot.slane %v53_v35, 1 }
 0x12b   :  { %v55_v38 = vadd.f32 %v54_v37, %v53_v35  ;;  %v66_v39 = vadd.f32 %v65_v36, %v64_v34  ;;  %v292_v35 = vpop.f32.mrf.mxu1 }
 0x12d   :  { %414 = vpush %v55_v38  ;;  %v67_v40 = vrot.slane %v66_v39, 1 }
 0x12f   :  { %v68_v41 = vadd.f32 %v67_v40, %v66_v39 }
 0x131   :  { %416 = vpush %v68_v41 }
 0x15e   :  { %s415_s2 = spop %414 }
 0x15f   :  { %s57_s3 = smul.f32 32.0, %s415_s2 }
 0x162   :  { %s417_s4 = spop %416 }
 0x163   :  { %s70_s5 = smul.f32 2.0, %s417_s4 }
 0x165   :  { %s71_s7 = ssub.f32 %s57_s3, %s70_s5 }
 0x167   :  { %s74_s8 = smul.f32 0.004166667, %s71_s7 }
 0x169   :  { %s77_s9 = smul.f32 0.25, %s74_s8 }
 0x16b   :  { %v78_v42 = vstv %s77_s9 }
 0x16c   :  { %426 = vrcp.f32 %v78_v42 }
 0x179   :  { %v427_v43 = vpop.eup %426 }
 0x17a   :  { %418 = vpush %v427_v43 }
 0x1ab   :  { %s419_s10 = spop %418 }
 0x1ac   :  { %s81_s11 = smul.f32 -1.0, %s419_s10 }
 0x1ae   :  { %v301_v59 = vstv %s81_s11 }
 0x1af   :  { %v302_v60 = vmul.f32 %v301_v59, %v205_v57  ;;  %v303_v61 = vmul.f32 %v301_v59, %v206_v58 }
 0x1b1   :  { %v304_v62 = vmul.f32 1.442695, %v302_v60  ;;  %v306_v63 = vmul.f32 1.442695, %v303_v61  ;;  %v308_v0 = vmul.f32 0.5, %v302_v60  ;;  %v309_v1 = vmul.f32 0.5, %v303_v61 }
 0x1b2   :  { %v316_v2 = vmul.f32 0.25, %v302_v60  ;;  %v317_v3 = vmul.f32 0.25, %v303_v61  ;;  %v324_v4 = vmul.f32 0.125, %v302_v60  ;;  %v325_v5 = vmul.f32 0.125, %v303_v61 }
 0x1b3   :  { %428 = vpow2.f32 %v304_v62  ;;  %v310_v6 = vmul.f32 1.442695, %v308_v0  ;;  %v312_v7 = vmul.f32 1.442695, %v309_v1  ;;  %v332_v8 = vmul.f32 0.0625, %v302_v60 }
 0x1b4   :  { %430 = vpow2.f32 %v306_v63  ;;  %v318_v9 = vmul.f32 1.442695, %v316_v2  ;;  %v320_v10 = vmul.f32 1.442695, %v317_v3  ;;  %v326_v11 = vmul.f32 1.442695, %v324_v4 }
 0x1b5   :  { %432 = vpow2.f32 %v310_v6  ;;  %v333_v12 = vmul.f32 0.0625, %v303_v61  ;;  %v328_v13 = vmul.f32 1.442695, %v325_v5  ;;  %v334_v14 = vmul.f32 1.442695, %v332_v8 }
 0x1b6   :  { %434 = vpow2.f32 %v312_v7 }
 0x1b7   :  { %436 = vpow2.f32 %v318_v9  ;;  %v336_v15 = vmul.f32 1.442695, %v333_v12 }
 0x1b8   :  { %438 = vpow2.f32 %v320_v10 }
 0x1b9   :  { %440 = vpow2.f32 %v326_v11 }
 0x1ba   :  { %442 = vpow2.f32 %v328_v13 }
 0x1bb   :  { %444 = vpow2.f32 %v334_v14 }
 0x1bc   :  { %446 = vpow2.f32 %v336_v15 }
 0x1c0   :  { %v429_v16 = vpop.eup %428 }
 0x1c1   :  { %v431_v17 = vpop.eup %430 }
 0x1c2   :  { %v433_v18 = vpop.eup %432 }
 0x1c3   :  { %v435_v19 = vpop.eup %434  ;;  %v314_v20 = vadd.f32 %v433_v18, %v429_v16 }
 0x1c4   :  { %v437_v21 = vpop.eup %436  ;;  %v315_v22 = vadd.f32 %v435_v19, %v431_v17 }
 0x1c5   :  { %v439_v23 = vpop.eup %438  ;;  %v322_v24 = vadd.f32 %v437_v21, %v314_v20 }
 0x1c6   :  { %v441_v25 = vpop.eup %440  ;;  %v323_v27 = vadd.f32 %v439_v23, %v315_v22 }
 0x1c7   :  { %v443_v28 = vpop.eup %442  ;;  %v330_v29 = vadd.f32 %v441_v25, %v322_v24 }
 0x1c8   :  { %v445_v30 = vpop.eup %444  ;;  %v331_v31 = vadd.f32 %v443_v28, %v323_v27 }
 0x1c9   :  { %v447_v32 = vpop.eup %446  ;;  %v338_v33 = vadd.f32 %v445_v30, %v330_v29 }
 0x1ca   :  { %v339_v34 = vadd.f32 %v447_v32, %v331_v31 }
 0x1cb   :  { %v340_v36 = vmul.f32 %v338_v33, %v292_v35  ;;  %v355_v41 = vsel %vm342_vm4, %v338_v33, 0.0 }
 0x1cc   :  { %v341_v37 = vmul.f32 %v413_v26, %v339_v34  ;;  %v356_v42 = vsel %vm342_vm4, %v339_v34, 0.0 }
 0x1cd   :  { %v343_v38 = vsel %vm342_vm4, %v340_v36, 0.0  ;;  %v357_v43 = vadd.f32 %v356_v42, %v355_v41 }
 0x1ce   :  { %v344_v39 = vsel %vm342_vm4, %v341_v37, 0.0 }
 0x1cf   :  { %v345_v40 = vadd.f32 %v344_v39, %v343_v38 }
 0x1d1   :  { %346 = vadd.xlane.f32.xlu1 %v345_v40 }
 0x1d5   :  { %358 = vadd.xlane.f32.xlu1 %v357_v43 }
 0x25a   :  { %v347_v44 = vpop.xlane.xlu1 %346 }
 0x25b   :  { %v348_v45 = vrot.slane %v347_v44, 4 }
 0x25d   :  { %v349_v46 = vadd.f32 %v348_v45, %v347_v44 }
 0x25e   :  { %v359_v47 = vpop.xlane.xlu1 %358 }
 0x25f   :  { %v350_v48 = vrot.slane %v349_v46, 2  ;;  %v360_v49 = vrot.slane %v359_v47, 4 }
 0x261   :  { %v361_v50 = vadd.f32 %v360_v49, %v359_v47  ;;  %v351_v51 = vadd.f32 %v350_v48, %v349_v46 }
 0x263   :  { %v362_v52 = vrot.slane %v361_v50, 2  ;;  %v352_v53 = vrot.slane %v351_v51, 1 }
 0x265   :  { %v363_v54 = vadd.f32 %v362_v52, %v361_v50  ;;  %v353_v55 = vadd.f32 %v352_v53, %v351_v51 }
 0x267   :  { %420 = vpush %v353_v55  ;;  %v364_v56 = vrot.slane %v363_v54, 1 }
 0x269   :  { %v365_v57 = vadd.f32 %v364_v56, %v363_v54 }
 0x26b   :  { %422 = vpush %v365_v57 }
 0x298   :  { %s421_s12 = spop %420 }
 0x29c   :  { %s423_s13 = spop %422 }
 0x29d   :  { %p367_p0 = scmp.ne.f32.partialorder %s423_s13, %s423_s13 }
 0x29f   :  { %s533_s12 = smov (%p367_p0, %s421_s12), 0.0 }
 0x2a0   :  { %370 = sst [smem:[#allocation2]] %s533_s12 }
 0x2a1   :  { %378 = dma.smem_to_hbm %s458_s14, 16, %s531_s6, [#allocation3]  }
 0x2a2   :  { %456 = dma.done.wait [#allocation3], 16  }
 0x2a3   :  { %457 = vsyncadd [#allocation3], 4294967280 }
 0x2a4   :  { %382 = sfence }
 0x2a5   :  { %383 = vsyncpa [#allocation3], 1 }

</bundles_post_ra>
